<compile_context>
chip_gen: v5e
topology: v5e:2x2
jax: 0.10.0
libtpu: 0.0.40
codegen_flags: <defaults>
</compile_context>

<pallas_src>
import functools

import jax
import jax.numpy as jnp
from jax.experimental import pallas as pl
from jax.experimental.pallas import tpu as pltpu

EPS = 1e-5
LANES = 128     # pad Cout to a multiple of 128 lanes -> dense vst (no vst.msk)
TM_MAX = 512    # M-tile; ~85% of HBM roofline for mem-bound kernels
                # (use 256 on v7x if you want >=2 grid steps for megacore at small M)


def _round_up(x, m):
    return (x + m - 1) // m * m


# ---------------------------------------------------------------------------
# Pallas kernel: fused  (patches @ W) * scale + bias (+ residual) (+ ReLU)
#   patches/W in bf16, matmul accumulates in f32, epilogue in f32.
# ---------------------------------------------------------------------------
def conv_bn_kernel(p_ref, w_ref, s_ref, b_ref, *rest, relu, has_residual):
    if has_residual:
        r_ref, o_ref = rest
    else:
        (o_ref,) = rest
    acc = jnp.dot(p_ref[...], w_ref[...], preferred_element_type=jnp.float32)
    acc = acc * s_ref[...] + b_ref[...]          # folded BatchNorm (f32)
    if has_residual:
        acc = acc + r_ref[...]                   # residual add (f32)
    if relu:
        acc = jnp.maximum(acc, 0.0)
    o_ref[...] = acc.astype(o_ref.dtype)


def conv_bn_pallas(patches, w2d, scale, bias, residual=None, *, relu,
                   out_dtype=jnp.float32):
    """patches: [M, K*Cin]; w2d: [K*Cin, Cout]; scale/bias: [1, Cout];
    residual (optional): [M, Cout_p] f32 with zero in the padded channels.
    Returns [M, Cout_p], Cout_p = round_up(Cout, 128)."""
    M, KC = patches.shape
    Cout = w2d.shape[1]
    Cout_p = _round_up(Cout, LANES)

    # Pad only the small per-channel tensors so the output is lane-dense.
    if Cout_p != Cout:
        w2d = jnp.pad(w2d, ((0, 0), (0, Cout_p - Cout)))
        scale = jnp.pad(scale, ((0, 0), (0, Cout_p - Cout)))
        bias = jnp.pad(bias, ((0, 0), (0, Cout_p - Cout)))

    patches = patches.astype(jnp.bfloat16)       # bf16 MXU input, half the DMA bytes
    w2d = w2d.astype(jnp.bfloat16)
    scale = scale.astype(jnp.float32)
    bias = bias.astype(jnp.float32)

    tm = M if M <= TM_MAX else TM_MAX            # single full-M block when it fits
    grid = (pl.cdiv(M, tm),)                     # no HBM-wide pad of patches along M

    in_specs = [
        pl.BlockSpec((tm, KC), lambda i: (i, 0)),
        pl.BlockSpec((KC, Cout_p), lambda i: (0, 0)),   # constant map -> DMA'd once
        pl.BlockSpec((1, Cout_p), lambda i: (0, 0)),
        pl.BlockSpec((1, Cout_p), lambda i: (0, 0)),
    ]
    args = [patches, w2d, scale, bias]
    if residual is not None:
        assert residual.shape == (M, Cout_p), residual.shape
        in_specs.append(pl.BlockSpec((tm, Cout_p), lambda i: (i, 0)))
        args.append(residual.astype(jnp.float32))

    kernel = functools.partial(conv_bn_kernel, relu=relu,
                               has_residual=residual is not None)
    # TODO(synk): for real ResNet channel counts add a Cout grid axis (256-wide
    # tiles, innermost/"arbitrary") and set vmem_limit_bytes so the plan also
    # fits v7x's 64 MiB VMEM; longer term, replace HBM im2col with halo-tiled
    # NHWC input (and fuse conv1+conv2 keeping h1 resident in VMEM).
    return pl.pallas_call(
        kernel,
        out_shape=jax.ShapeDtypeStruct((M, Cout_p), out_dtype),
        grid_spec=pltpu.PrefetchScalarGridSpec(
            num_scalar_prefetch=0,
            grid=grid,
            in_specs=in_specs,
            out_specs=pl.BlockSpec((tm, Cout_p), lambda i: (i, 0)),
        ),
        compiler_params=pltpu.CompilerParams(
            dimension_semantics=("parallel",)),
    )(*args)


# ---------------------------------------------------------------------------
# Glue: im2col (reshape/slice/concat only) and weight/BN reshaping in plain JAX
# ---------------------------------------------------------------------------
def im2col(x_nhwc, kh, kw, stride, padding):
    """[N,H,W,C] -> ([N*Ho*Wo, kh*kw*C], (N,Ho,Wo)); tap order (ky, kx, c)."""
    x = x_nhwc
    if padding:
        x = jnp.pad(x, ((0, 0), (padding, padding), (padding, padding), (0, 0)))
    N, Hp, Wp, C = x.shape
    Ho = (Hp - kh) // stride + 1
    Wo = (Wp - kw) // stride + 1
    cols = []
    for ky in range(kh):
        for kx in range(kw):
            sl = x[:, ky:ky + stride * Ho:stride, kx:kx + stride * Wo:stride, :]
            cols.append(sl.reshape(N * Ho * Wo, C))
    return jnp.concatenate(cols, axis=-1), (N, Ho, Wo)


def to_matrix_weights(w_oihw):
    # [Cout, Cin, kh, kw] -> [kh*kw*Cin, Cout]  (matches im2col (ky, kx, c) order)
    Cout, Cin, kh, kw = w_oihw.shape
    return jnp.transpose(w_oihw, (2, 3, 1, 0)).reshape(kh * kw * Cin, Cout)


def fold_bn(gamma, beta, mean, var):
    scale = gamma / jnp.sqrt(var + EPS)
    bias = beta - mean * scale
    return scale[None, :], bias[None, :]


# ---------------------------------------------------------------------------
# ResBlock forward using the Pallas kernel for every conv+BN(+add)(+ReLU)
# ---------------------------------------------------------------------------
def resblock_forward(x_nchw, p, stride):
    x = jnp.transpose(x_nchw, (0, 2, 3, 1)).astype(jnp.float32)  # NHWC
    N, H, W, Cin = x.shape
    Cout = p["w1"].shape[0]
    Cout_p = _round_up(Cout, LANES)

    # ---- shortcut branch (residual fed to the conv2 kernel, padded to Cout_p)
    if stride != 1 or Cin != Cout:
        sc_p, (_, Ho, Wo) = im2col(x, 1, 1, stride, 0)
        sc_s, sc_b = fold_bn(p["g_sc"], p["b_sc"], p["m_sc"], p["v_sc"])
        sc = conv_bn_pallas(sc_p, to_matrix_weights(p["w_sc"]), sc_s, sc_b,
                            relu=False, out_dtype=jnp.float32)   # [M, Cout_p]
    else:
        Ho, Wo = H, W
        sc = x.reshape(N * H * W, Cin)
        if Cout_p != Cout:
            sc = jnp.pad(sc, ((0, 0), (0, Cout_p - Cout)))

    # ---- conv1 3x3 stride s + BN + ReLU  (no residual stream), h1 emitted bf16
    p1, _ = im2col(x, 3, 3, stride, 1)
    s1, b1 = fold_bn(p["g1"], p["b1"], p["m1"], p["v1"])
    h1 = conv_bn_pallas(p1, to_matrix_weights(p["w1"]), s1, b1,
                        relu=True, out_dtype=jnp.bfloat16)        # [M, Cout_p]
    h1 = h1[:, :Cout].reshape(N, Ho, Wo, Cout)                    # drop lane padding

    # ---- conv2 3x3 stride 1 + BN + residual add + final ReLU (fully fused)
    p2, _ = im2col(h1, 3, 3, 1, 1)                                # bf16 patches
    s2, b2 = fold_bn(p["g2"], p["b2"], p["m2"], p["v2"])
    out = conv_bn_pallas(p2, to_matrix_weights(p["w2"]), s2, b2, residual=sc,
                         relu=True, out_dtype=jnp.float32)        # [M, Cout_p]

    out = out[:, :Cout].reshape(N, Ho, Wo, Cout)
    return jnp.transpose(out, (0, 3, 1, 2))                       # back to NCHW


# ---------------------------------------------------------------------------
# Reference (lax conv, full f32 accumulation) for correctness checking.
# Inputs/weights/h1 are rounded to bf16 to match the kernel's MXU input format.
# ---------------------------------------------------------------------------
def _q(a):
    return a.astype(jnp.bfloat16).astype(jnp.float32)


def conv2d_ref(x, w, stride, padding):
    return jax.lax.conv_general_dilated(
        x, w, (stride, stride), ((padding, padding), (padding, padding)),
        dimension_numbers=("NCHW", "OIHW", "NCHW"),
        precision=jax.lax.Precision.HIGHEST)


def bn_ref(x, g, b, m, v):
    return ((x - m[None, :, None, None]) / jnp.sqrt(v[None, :, None, None] + EPS)
            * g[None, :, None, None] + b[None, :, None, None])


def resblock_ref(x, p, stride, Cin, Cout):
    h = conv2d_ref(_q(x), _q(p["w1"]), stride, 1)
    h = jnp.maximum(bn_ref(h, p["g1"], p["b1"], p["m1"], p["v1"]), 0.0)
    h = conv2d_ref(_q(h), _q(p["w2"]), 1, 1)
    h = bn_ref(h, p["g2"], p["b2"], p["m2"], p["v2"])
    if stride != 1 or Cin != Cout:
        sc = conv2d_ref(_q(x), _q(p["w_sc"]), stride, 0)
        sc = bn_ref(sc, p["g_sc"], p["b_sc"], p["m_sc"], p["v_sc"])
    else:
        sc = x
    return jnp.maximum(h + sc, 0.0)


# ---------------------------------------------------------------------------
# Deterministic parameter init (synthetic; no checkpoint loading)
# ---------------------------------------------------------------------------
def make_params(key, Cin, Cout, stride):
    ks = jax.random.split(key, 12)
    p = {
        "w1": jax.random.normal(ks[0], (Cout, Cin, 3, 3), jnp.float32) * 0.2,
        "g1": jax.random.uniform(ks[1], (Cout,), jnp.float32, 0.5, 1.5),
        "b1": jax.random.normal(ks[2], (Cout,), jnp.float32) * 0.1,
        "m1": jax.random.normal(ks[3], (Cout,), jnp.float32) * 0.1,
        "v1": jax.random.uniform(ks[4], (Cout,), jnp.float32, 0.5, 1.5),
        "w2": jax.random.normal(ks[5], (Cout, Cout, 3, 3), jnp.float32) * 0.2,
        "g2": jax.random.uniform(ks[6], (Cout,), jnp.float32, 0.5, 1.5),
        "b2": jax.random.normal(ks[7], (Cout,), jnp.float32) * 0.1,
        "m2": jax.random.normal(ks[8], (Cout,), jnp.float32) * 0.1,
        "v2": jax.random.uniform(ks[9], (Cout,), jnp.float32, 0.5, 1.5),
    }
    if stride != 1 or Cin != Cout:
        ks2 = jax.random.split(ks[10], 5)
        p.update({
            "w_sc": jax.random.normal(ks2[0], (Cout, Cin, 1, 1), jnp.float32) * 0.2,
            "g_sc": jax.random.uniform(ks2[1], (Cout,), jnp.float32, 0.5, 1.5),
            "b_sc": jax.random.normal(ks2[2], (Cout,), jnp.float32) * 0.1,
            "m_sc": jax.random.normal(ks2[3], (Cout,), jnp.float32) * 0.1,
            "v_sc": jax.random.uniform(ks2[4], (Cout,), jnp.float32, 0.5, 1.5),
        })
    return p


if __name__ == "__main__":
    key = jax.random.PRNGKey(0)
    kx, kp1, kp2 = jax.random.split(key, 3)
    x = jax.random.normal(kx, (2, 4, 16, 16), jnp.float32)  # NCHW

    configs = [
        (4, 4, 1),   # identity shortcut
        (4, 8, 2),   # conv1x1 shortcut, strided
    ]
    for (Cin, Cout, stride), kp in zip(configs, (kp1, kp2)):
        params = make_params(kp, Cin, Cout, stride)
        out = resblock_forward(x, params, stride)
        out = jax.block_until_ready(out)
        ref = resblock_ref(x, params, stride, Cin, Cout)
        assert out.shape == ref.shape, (out.shape, ref.shape)
        # bf16 matmul inputs -> allow bf16-level tolerance (structural bugs give O(1) errors)
        assert jnp.allclose(out, ref, atol=5e-2, rtol=5e-2), (
            f"mismatch max_abs_err={float(jnp.max(jnp.abs(out - ref)))}")

    print("KERNEL_OK")
</pallas_src>

<mosaic_0001>
module attributes {stable_mosaic.version = 11 : i64} {
  func.func @conv_bn_kernel(%arg0: i32, %arg1: memref<512x36xbf16, #tpu.memory_space<vmem>>, %arg2: memref<36x128xbf16, #tpu.memory_space<vmem>>, %arg3: memref<1x128xf32, #tpu.memory_space<vmem>>, %arg4: memref<1x128xf32, #tpu.memory_space<vmem>>, %arg5: memref<512x128xbf16, #tpu.memory_space<vmem>>) attributes {dimension_semantics = [#tpu.dimension_semantics<parallel>], iteration_bounds = array<i64: 1>, scalar_prefetch = 0 : i64, scratch_operands = 0 : i64, tpu.core_type = #tpu.core_type<tc>, window_params = [{transform_indices = @transform_0, window_bounds = array<i64: 512, 36>}, {pipeline_mode = #tpu.pipeline_mode<synchronous>, transform_indices = @transform_1, window_bounds = array<i64: 36, 128>}, {pipeline_mode = #tpu.pipeline_mode<synchronous>, transform_indices = @transform_2, window_bounds = array<i64: 1, 128>}, {pipeline_mode = #tpu.pipeline_mode<synchronous>, transform_indices = @transform_3, window_bounds = array<i64: 1, 128>}, {transform_indices = @transform_4, window_bounds = array<i64: 512, 128>}]} {
    %c0 = arith.constant 0 : index
    %c0_0 = arith.constant 0 : index
    %0 = vector.load %arg1[%c0, %c0_0] : memref<512x36xbf16, #tpu.memory_space<vmem>>, vector<512x36xbf16>
    %c0_1 = arith.constant 0 : index
    %c0_2 = arith.constant 0 : index
    %1 = vector.load %arg2[%c0_1, %c0_2] : memref<36x128xbf16, #tpu.memory_space<vmem>>, vector<36x128xbf16>
    %cst = arith.constant dense<0.000000e+00> : vector<512x128xf32>
    %2 = tpu.matmul %0, %1, %cst {dimension_numbers = #tpu.dot_dimension_numbers<[1], [0], [0], [1], [0, 0, 1, 1], [], []>} : vector<512x36xbf16>, vector<36x128xbf16>, vector<512x128xf32> -> vector<512x128xf32>
    %c0_3 = arith.constant 0 : index
    %c0_4 = arith.constant 0 : index
    %3 = vector.load %arg3[%c0_3, %c0_4] : memref<1x128xf32, #tpu.memory_space<vmem>>, vector<1x128xf32>
    %4 = vector.broadcast %3 : vector<1x128xf32> to vector<512x128xf32>
    %5 = arith.mulf %2, %4 : vector<512x128xf32>
    %c0_5 = arith.constant 0 : index
    %c0_6 = arith.constant 0 : index
    %6 = vector.load %arg4[%c0_5, %c0_6] : memref<1x128xf32, #tpu.memory_space<vmem>>, vector<1x128xf32>
    %7 = vector.broadcast %6 : vector<1x128xf32> to vector<512x128xf32>
    %8 = arith.addf %5, %7 : vector<512x128xf32>
    %cst_7 = arith.constant 0.000000e+00 : f32
    %9 = vector.broadcast %cst_7 : f32 to vector<512x128xf32>
    %10 = arith.maximumf %8, %9 : vector<512x128xf32>
    %11 = arith.truncf %10 : vector<512x128xf32> to vector<512x128xbf16>
    %c0_8 = arith.constant 0 : index
    %c0_9 = arith.constant 0 : index
    %12 = vector.load %arg5[%c0_8, %c0_9] : memref<512x128xbf16, #tpu.memory_space<vmem>>, vector<512x128xbf16>
    tpu.vector_store %arg5[%c0_8, %c0_9], %11 {strides = array<i32>} : memref<512x128xbf16, #tpu.memory_space<vmem>>, vector<512x128xbf16>,
    return
  }
  func.func @transform_0(%arg0: i32) -> (i32, i32) {
    %c0_i32 = arith.constant 0 : i32
    %c0_i32_0 = arith.constant 0 : i32
    return %arg0, %c0_i32 : i32, i32
  }
  func.func @transform_1(%arg0: i32) -> (i32, i32) {
    %c0_i32 = arith.constant 0 : i32
    %c0_i32_0 = arith.constant 0 : i32
    %c0_i32_1 = arith.constant 0 : i32
    return %c0_i32, %c0_i32_0 : i32, i32
  }
  func.func @transform_2(%arg0: i32) -> (i32, i32) {
    %c0_i32 = arith.constant 0 : i32
    %c0_i32_0 = arith.constant 0 : i32
    %c0_i32_1 = arith.constant 0 : i32
    return %c0_i32, %c0_i32_0 : i32, i32
  }
  func.func @transform_3(%arg0: i32) -> (i32, i32) {
    %c0_i32 = arith.constant 0 : i32
    %c0_i32_0 = arith.constant 0 : i32
    %c0_i32_1 = arith.constant 0 : i32
    return %c0_i32, %c0_i32_0 : i32, i32
  }
  func.func @transform_4(%arg0: i32) -> (i32, i32) {
    %c0_i32 = arith.constant 0 : i32
    %c0_i32_0 = arith.constant 0 : i32
    return %arg0, %c0_i32 : i32, i32
  }
}

</mosaic_0001>

<bundles_post_ra>
// kernel: tpu_custom_call.1
= control target key start
LH: loop header
LB: loop body
LE: loop exit
PB: predicated region body
PF: predicated region fallthrough
CT: control target
= control target key end

     0   :  { %vm360_vm0 = vcmask 1041408   ;;  %s1618_s0 = inlined_call_operand.vmem [shape: bf16[512,36], index: 0, kind: input, shape index: {}]   ;;  %s1619_s1 = inlined_call_operand.vmem [shape: bf16[36,128], index: 1, kind: input, shape index: {}]   ;;  %s1620_s2 = inlined_call_operand.vmem [shape: f32[1,128], index: 2, kind: input, shape index: {}]   ;;  %s1621_s3 = inlined_call_operand.vmem [shape: f32[1,128], index: 3, kind: input, shape index: {}]   ;;  %s1622_s4 = inlined_call_operand.hbm [shape: bf16[512,128], index: 4, kind: output, shape index: {}]  }
   0x1   :  { %v87_v0 = vld [vmem:[%s1619_s1 + $0x10] sm:$0x3] }
   0x2   :  { %v257_v1 = vunpack.c.l.b16 %v87_v0 }
   0x4   :  { %v260_v2 = vpack.c.b16 %v257_v1, %v257_v1 }
   0x5   :  { %9 = vsyncpa [#allocation3], 0  ;;  %v1080_v4 = vld [vmem:[%s1619_s1 + $0x8] sm:$0xff]  ;;  %v1079_v5 = vld [vmem:[%s1619_s1] sm:$0xff]  ;;  %vm263_vm1 = vcmask 293888   ;;  %s867_s9 = sshll.u32 %s1622_s4, 4  ;;  %s868_s9 = int_to_ptr.hbm [resolvable:$true] %s867_s9 }
   0x6   :  { %v362_v3 = vsel %vm360_vm0, %v260_v2, 0  ;;  %v1047_v6 = vld [vmem:[%s1618_s0] sm:$0xff]  ;;  %v1048_v10 = vld [vmem:[%s1618_s0 + $0x8] sm:$0xff]  ;;  %v1049_v14 = vld [vmem:[%s1618_s0 + $0x10] sm:$0xff]  ;;  %s1313_s10 = smov 64   ;;  %s1314_s11 = smov 4  }
   0x7   :  { %369 = vmatpush.bf16.msra.mxu0 %v362_v3  ;;  %1272 = vmatpush.bf16.msra.mxu1 %v362_v3  ;;  %v1055_v7 = vld [vmem:[%s1618_s0 + $0x40] sm:$0xff]  ;;  %v1056_v11 = vld [vmem:[%s1618_s0 + $0x48] sm:$0xff]  ;;  %v1057_v15 = vld [vmem:[%s1618_s0 + $0x50] sm:$0xff] }
   0x8   :  { %1273 = vmatpush.bf16.msra.mxu2 %v362_v3  ;;  %1274 = vmatpush.bf16.msra.mxu3 %v362_v3  ;;  %v1063_v8 = vld [vmem:[%s1618_s0 + $0x80] sm:$0xff]  ;;  %v1064_v12 = vld [vmem:[%s1618_s0 + $0x88] sm:$0xff]  ;;  %v1065_v16 = vld [vmem:[%s1618_s0 + $0x90] sm:$0xff] }
   0x9   :  { %v1071_v9 = vld [vmem:[%s1618_s0 + $0xc0] sm:$0xff]  ;;  %v1072_v13 = vld [vmem:[%s1618_s0 + $0xc8] sm:$0xff]  ;;  %v1073_v17 = vld [vmem:[%s1618_s0 + $0xd0] sm:$0xff] }
   0xa   :  { %v1050_v18 = vld [vmem:[%s1618_s0 + $0x18] sm:$0xff]  ;;  %v1051_v22 = vld [vmem:[%s1618_s0 + $0x20] sm:$0xff]  ;;  %v1052_v26 = vld [vmem:[%s1618_s0 + $0x28] sm:$0xff] }
   0xb   :  { %370 = vmatpush.bf16.msra.mxu0 %v1080_v4  ;;  %1275 = vmatpush.bf16.msra.mxu1 %v1080_v4  ;;  %v1058_v19 = vld [vmem:[%s1618_s0 + $0x58] sm:$0xff]  ;;  %v1059_v23 = vld [vmem:[%s1618_s0 + $0x60] sm:$0xff]  ;;  %v1060_v27 = vld [vmem:[%s1618_s0 + $0x68] sm:$0xff] }
   0xc   :  { %1276 = vmatpush.bf16.msra.mxu2 %v1080_v4  ;;  %1277 = vmatpush.bf16.msra.mxu3 %v1080_v4  ;;  %v1066_v20 = vld [vmem:[%s1618_s0 + $0x98] sm:$0xff]  ;;  %v1067_v24 = vld [vmem:[%s1618_s0 + $0xa0] sm:$0xff]  ;;  %v1068_v28 = vld [vmem:[%s1618_s0 + $0xa8] sm:$0xff] }
   0xd   :  { %v1074_v21 = vld [vmem:[%s1618_s0 + $0xd8] sm:$0xff]  ;;  %v1075_v25 = vld [vmem:[%s1618_s0 + $0xe0] sm:$0xff]  ;;  %v1076_v29 = vld [vmem:[%s1618_s0 + $0xe8] sm:$0xff] }
   0xe   :  { %v1053_v30 = vld [vmem:[%s1618_s0 + $0x30] sm:$0xff]  ;;  %v1054_v34 = vld [vmem:[%s1618_s0 + $0x38] sm:$0xff]  ;;  %v1480_v40 = vld [vmem:[%s1620_s2] ss:$0 sm:$0xff] }
   0xf   :  { %371 = vmatpush.bf16.msra.mxu0 %v1079_v5  ;;  %1278 = vmatpush.bf16.msra.mxu1 %v1079_v5  ;;  %v1061_v31 = vld [vmem:[%s1618_s0 + $0x70] sm:$0xff]  ;;  %v1062_v35 = vld [vmem:[%s1618_s0 + $0x78] sm:$0xff]  ;;  %v1486_v42 = vld [vmem:[%s1621_s3] ss:$0 sm:$0xff] }
  0x10   :  { %1279 = vmatpush.bf16.msra.mxu2 %v1079_v5  ;;  %1280 = vmatpush.bf16.msra.mxu3 %v1079_v5  ;;  %v1069_v32 = vld [vmem:[%s1618_s0 + $0xb0] sm:$0xff]  ;;  %v1070_v36 = vld [vmem:[%s1618_s0 + $0xb8] sm:$0xff] }
  0x11   :  { %v1077_v33 = vld [vmem:[%s1618_s0 + $0xf0] sm:$0xff]  ;;  %v1078_v37 = vld [vmem:[%s1618_s0 + $0xf8] sm:$0xff]  ;;  %s1312_s0 = smov [#allocation2]  }
  0x12   :  { %1015 = vmatmul.msk.bf16.vlgmr.msra.gmra.mxu0 %vm263_vm1, %v1047_v6  ;;  %1023 = vmatmul.msk.bf16.vlgmr.msra.gmra.mxu1 %vm263_vm1, %v1055_v7  ;;  %s865_s2 = sshll.u32 %s1312_s0, 4  ;;  %s866_s2 = int_to_ptr.vmem [resolvable:$true] %s865_s2 }
  0x13   :  { %1031 = vmatmul.msk.bf16.vlgmr.msra.gmra.mxu2 %vm263_vm1, %v1063_v8  ;;  %1039 = vmatmul.msk.bf16.vlgmr.msra.gmra.mxu3 %vm263_vm1, %v1071_v9 }
  0x22   :  { %1016 = vmatmul.msk.bf16.gmra.mxu0 %vm263_vm1, %v1048_v10  ;;  %1024 = vmatmul.msk.bf16.gmra.mxu1 %vm263_vm1, %v1056_v11 }
  0x23   :  { %1032 = vmatmul.msk.bf16.gmra.mxu2 %vm263_vm1, %v1064_v12  ;;  %1040 = vmatmul.msk.bf16.gmra.mxu3 %vm263_vm1, %v1072_v13 }
  0x32   :  { %1017 = vmatmul.msk.bf16.gmra.mxu0 %vm263_vm1, %v1049_v14  ;;  %1025 = vmatmul.msk.bf16.gmra.mxu1 %vm263_vm1, %v1057_v15 }
  0x33   :  { %1033 = vmatmul.msk.bf16.gmra.mxu2 %vm263_vm1, %v1065_v16  ;;  %1041 = vmatmul.msk.bf16.gmra.mxu3 %vm263_vm1, %v1073_v17 }
  0x42   :  { %1018 = vmatmul.msk.bf16.gmra.mxu0 %vm263_vm1, %v1050_v18  ;;  %1026 = vmatmul.msk.bf16.gmra.mxu1 %vm263_vm1, %v1058_v19 }
  0x43   :  { %1034 = vmatmul.msk.bf16.gmra.mxu2 %vm263_vm1, %v1066_v20  ;;  %1042 = vmatmul.msk.bf16.gmra.mxu3 %vm263_vm1, %v1074_v21 }
  0x52   :  { %1019 = vmatmul.msk.bf16.gmra.mxu0 %vm263_vm1, %v1051_v22  ;;  %1027 = vmatmul.msk.bf16.gmra.mxu1 %vm263_vm1, %v1059_v23 }
  0x53   :  { %1035 = vmatmul.msk.bf16.gmra.mxu2 %vm263_vm1, %v1067_v24  ;;  %1043 = vmatmul.msk.bf16.gmra.mxu3 %vm263_vm1, %v1075_v25 }
  0x62   :  { %1020 = vmatmul.msk.bf16.gmra.mxu0 %vm263_vm1, %v1052_v26  ;;  %1028 = vmatmul.msk.bf16.gmra.mxu1 %vm263_vm1, %v1060_v27 }
  0x63   :  { %1036 = vmatmul.msk.bf16.gmra.mxu2 %vm263_vm1, %v1068_v28  ;;  %1044 = vmatmul.msk.bf16.gmra.mxu3 %vm263_vm1, %v1076_v29 }
  0x72   :  { %1021 = vmatmul.msk.bf16.gmra.mxu0 %vm263_vm1, %v1053_v30  ;;  %1029 = vmatmul.msk.bf16.gmra.mxu1 %vm263_vm1, %v1061_v31 }
  0x73   :  { %1037 = vmatmul.msk.bf16.gmra.mxu2 %vm263_vm1, %v1069_v32  ;;  %1045 = vmatmul.msk.bf16.gmra.mxu3 %vm263_vm1, %v1077_v33 }
  0x82   :  { %1022 = vmatmul.msk.bf16.gmra.mxu0 %vm263_vm1, %v1054_v34  ;;  %1030 = vmatmul.msk.bf16.gmra.mxu1 %vm263_vm1, %v1062_v35 }
  0x83   :  { %1038 = vmatmul.msk.bf16.gmra.mxu2 %vm263_vm1, %v1070_v36  ;;  %1046 = vmatmul.msk.bf16.gmra.mxu3 %vm263_vm1, %v1078_v37 }
  0x8f   :  { %v373_v38 = vpop.f32.mrf.mxu0  ;;  %v413_v39 = vpop.f32.mrf.mxu1 }
  0x90   :  { %v537_v41 = vmul.f32 %v1480_v40, %v373_v38  ;;  %v553_v43 = vmul.f32 %v1480_v40, %v413_v39 }
  0x92   :  { %v605_v48 = vadd.f32 %v1486_v42, %v537_v41  ;;  %v621_v49 = vadd.f32 %v1486_v42, %v553_v43 }
  0x94   :  { %v669_v56 = vmax.f32 %v605_v48, 0.0  ;;  %v685_v57 = vmax.f32 %v621_v49, 0.0 }
  0x96   :  { %v453_v44 = vpop.f32.mrf.mxu2  ;;  %v493_v45 = vpop.f32.mrf.mxu3 }
  0x97   :  { %v375_v46 = vpop.f32.mrf.mxu0  ;;  %v415_v47 = vpop.f32.mrf.mxu1  ;;  %v569_v54 = vmul.f32 %v1480_v40, %v453_v44  ;;  %v585_v55 = vmul.f32 %v1480_v40, %v493_v45 }
  0x98   :  { %v538_v50 = vmul.f32 %v1480_v40, %v375_v46  ;;  %v554_v51 = vmul.f32 %v1480_v40, %v415_v47 }
  0x99   :  { %v637_v0 = vadd.f32 %v1486_v42, %v569_v54  ;;  %v653_v1 = vadd.f32 %v1486_v42, %v585_v55 }
  0x9a   :  { %v606_v52 = vadd.f32 %v1486_v42, %v538_v50  ;;  %v622_v53 = vadd.f32 %v1486_v42, %v554_v51 }
  0x9b   :  { %v701_v8 = vmax.f32 %v637_v0, 0.0  ;;  %v717_v9 = vmax.f32 %v653_v1, 0.0 }
  0x9c   :  { %v670_v58 = vmax.f32 %v606_v52, 0.0  ;;  %v686_v59 = vmax.f32 %v622_v53, 0.0 }
  0x9e   :  { %v1084_v60 = vpack.c.bf16 %v670_v58, %v669_v56  ;;  %v1124_v61 = vpack.c.bf16 %v686_v59, %v685_v57  ;;  %v455_v62 = vpop.f32.mrf.mxu2  ;;  %v495_v63 = vpop.f32.mrf.mxu3 }
  0x9f   :  { %v570_v2 = vmul.f32 %v1480_v40, %v455_v62  ;;  %v586_v3 = vmul.f32 %v1480_v40, %v495_v63  ;;  %v378_v4 = vpop.f32.mrf.mxu0  ;;  %v418_v5 = vpop.f32.mrf.mxu1 }
  0xa0   :  { %1085 = vst [vmem:[#allocation2] sm:$0xff] %v1084_v60   ;;  %v539_v12 = vmul.f32 %v1480_v40, %v378_v4  ;;  %v555_v13 = vmul.f32 %v1480_v40, %v418_v5 }
  0xa1   :  { %1248 = vst [vmem:[#allocation2 + $0x40] sm:$0xff] %v1124_v61   ;;  %v638_v6 = vadd.f32 %v1486_v42, %v570_v2  ;;  %v654_v7 = vadd.f32 %v1486_v42, %v586_v3 }
  0xa2   :  { %v607_v20 = vadd.f32 %v1486_v42, %v539_v12  ;;  %v623_v21 = vadd.f32 %v1486_v42, %v555_v13 }
  0xa3   :  { %v702_v10 = vmax.f32 %v638_v6, 0.0  ;;  %v718_v11 = vmax.f32 %v654_v7, 0.0 }
  0xa4   :  { %v671_v28 = vmax.f32 %v607_v20, 0.0  ;;  %v687_v29 = vmax.f32 %v623_v21, 0.0 }
  0xa5   :  { %v1164_v14 = vpack.c.bf16 %v702_v10, %v701_v8  ;;  %v1204_v15 = vpack.c.bf16 %v718_v11, %v717_v9 }
  0xa6   :  { %v458_v16 = vpop.f32.mrf.mxu2  ;;  %v498_v17 = vpop.f32.mrf.mxu3 }
  0xa7   :  { %1256 = vst [vmem:[#allocation2 + $0x80] sm:$0xff] %v1164_v14   ;;  %v380_v18 = vpop.f32.mrf.mxu0  ;;  %v420_v19 = vpop.f32.mrf.mxu1  ;;  %v571_v26 = vmul.f32 %v1480_v40, %v458_v16  ;;  %v587_v27 = vmul.f32 %v1480_v40, %v498_v17 }
  0xa8   :  { %1264 = vst [vmem:[#allocation2 + $0xc0] sm:$0xff] %v1204_v15   ;;  %v540_v22 = vmul.f32 %v1480_v40, %v380_v18  ;;  %v556_v23 = vmul.f32 %v1480_v40, %v420_v19 }
  0xa9   :  { %v639_v36 = vadd.f32 %v1486_v42, %v571_v26  ;;  %v655_v37 = vadd.f32 %v1486_v42, %v587_v27 }
  0xaa   :  { %v608_v24 = vadd.f32 %v1486_v42, %v540_v22  ;;  %v624_v25 = vadd.f32 %v1486_v42, %v556_v23 }
  0xab   :  { %v703_v46 = vmax.f32 %v639_v36, 0.0  ;;  %v719_v47 = vmax.f32 %v655_v37, 0.0 }
  0xac   :  { %v672_v30 = vmax.f32 %v608_v24, 0.0  ;;  %v688_v31 = vmax.f32 %v624_v25, 0.0 }
  0xae   :  { %v1089_v32 = vpack.c.bf16 %v672_v30, %v671_v28  ;;  %v1129_v33 = vpack.c.bf16 %v688_v31, %v687_v29  ;;  %v460_v34 = vpop.f32.mrf.mxu2  ;;  %v500_v35 = vpop.f32.mrf.mxu3 }
  0xaf   :  { %v572_v38 = vmul.f32 %v1480_v40, %v460_v34  ;;  %v588_v39 = vmul.f32 %v1480_v40, %v500_v35  ;;  %v383_v41 = vpop.f32.mrf.mxu0  ;;  %v423_v43 = vpop.f32.mrf.mxu1 }
  0xb0   :  { %1241 = vst [vmem:[#allocation2 + $0x8] sm:$0xff] %v1089_v32   ;;  %v541_v50 = vmul.f32 %v1480_v40, %v383_v41  ;;  %v557_v51 = vmul.f32 %v1480_v40, %v423_v43 }
  0xb1   :  { %1249 = vst [vmem:[#allocation2 + $0x48] sm:$0xff] %v1129_v33   ;;  %v640_v44 = vadd.f32 %v1486_v42, %v572_v38  ;;  %v656_v45 = vadd.f32 %v1486_v42, %v588_v39 }
  0xb2   :  { %v609_v58 = vadd.f32 %v1486_v42, %v541_v50  ;;  %v625_v59 = vadd.f32 %v1486_v42, %v557_v51 }
  0xb3   :  { %v704_v48 = vmax.f32 %v640_v44, 0.0  ;;  %v720_v49 = vmax.f32 %v656_v45, 0.0 }
  0xb4   :  { %v673_v2 = vmax.f32 %v609_v58, 0.0  ;;  %v689_v3 = vmax.f32 %v625_v59, 0.0 }
  0xb5   :  { %v1169_v52 = vpack.c.bf16 %v704_v48, %v703_v46  ;;  %v1209_v53 = vpack.c.bf16 %v720_v49, %v719_v47 }
  0xb6   :  { %v463_v54 = vpop.f32.mrf.mxu2  ;;  %v503_v55 = vpop.f32.mrf.mxu3 }
  0xb7   :  { %1257 = vst [vmem:[#allocation2 + $0x88] sm:$0xff] %v1169_v52   ;;  %v385_v56 = vpop.f32.mrf.mxu0  ;;  %v425_v57 = vpop.f32.mrf.mxu1  ;;  %v573_v0 = vmul.f32 %v1480_v40, %v463_v54  ;;  %v589_v1 = vmul.f32 %v1480_v40, %v503_v55 }
  0xb8   :  { %1265 = vst [vmem:[#allocation2 + $0xc8] sm:$0xff] %v1209_v53   ;;  %v542_v60 = vmul.f32 %v1480_v40, %v385_v56  ;;  %v558_v61 = vmul.f32 %v1480_v40, %v425_v57 }
  0xb9   :  { %v641_v10 = vadd.f32 %v1486_v42, %v573_v0  ;;  %v657_v11 = vadd.f32 %v1486_v42, %v589_v1 }
  0xba   :  { %v610_v62 = vadd.f32 %v1486_v42, %v542_v60  ;;  %v626_v63 = vadd.f32 %v1486_v42, %v558_v61 }
  0xbb   :  { %v705_v18 = vmax.f32 %v641_v10, 0.0  ;;  %v721_v19 = vmax.f32 %v657_v11, 0.0 }
  0xbc   :  { %v674_v4 = vmax.f32 %v610_v62, 0.0  ;;  %v690_v5 = vmax.f32 %v626_v63, 0.0 }
  0xbe   :  { %v1094_v6 = vpack.c.bf16 %v674_v4, %v673_v2  ;;  %v1134_v7 = vpack.c.bf16 %v690_v5, %v689_v3  ;;  %v465_v8 = vpop.f32.mrf.mxu2  ;;  %v505_v9 = vpop.f32.mrf.mxu3 }
  0xbf   :  { %v574_v12 = vmul.f32 %v1480_v40, %v465_v8  ;;  %v590_v13 = vmul.f32 %v1480_v40, %v505_v9  ;;  %v388_v14 = vpop.f32.mrf.mxu0  ;;  %v428_v15 = vpop.f32.mrf.mxu1 }
  0xc0   :  { %1242 = vst [vmem:[#allocation2 + $0x10] sm:$0xff] %v1094_v6   ;;  %v543_v22 = vmul.f32 %v1480_v40, %v388_v14  ;;  %v559_v23 = vmul.f32 %v1480_v40, %v428_v15 }
  0xc1   :  { %1250 = vst [vmem:[#allocation2 + $0x50] sm:$0xff] %v1134_v7   ;;  %v642_v16 = vadd.f32 %v1486_v42, %v574_v12  ;;  %v658_v17 = vadd.f32 %v1486_v42, %v590_v13 }
  0xc2   :  { %v611_v30 = vadd.f32 %v1486_v42, %v543_v22  ;;  %v627_v31 = vadd.f32 %v1486_v42, %v559_v23 }
  0xc3   :  { %v706_v20 = vmax.f32 %v642_v16, 0.0  ;;  %v722_v21 = vmax.f32 %v658_v17, 0.0 }
  0xc4   :  { %v675_v38 = vmax.f32 %v611_v30, 0.0  ;;  %v691_v39 = vmax.f32 %v627_v31, 0.0 }
  0xc5   :  { %v1174_v24 = vpack.c.bf16 %v706_v20, %v705_v18  ;;  %v1214_v25 = vpack.c.bf16 %v722_v21, %v721_v19 }
  0xc6   :  { %v468_v26 = vpop.f32.mrf.mxu2  ;;  %v508_v27 = vpop.f32.mrf.mxu3 }
  0xc7   :  { %1258 = vst [vmem:[#allocation2 + $0x90] sm:$0xff] %v1174_v24   ;;  %v390_v28 = vpop.f32.mrf.mxu0  ;;  %v430_v29 = vpop.f32.mrf.mxu1  ;;  %v575_v36 = vmul.f32 %v1480_v40, %v468_v26  ;;  %v591_v37 = vmul.f32 %v1480_v40, %v508_v27 }
  0xc8   :  { %1266 = vst [vmem:[#allocation2 + $0xd0] sm:$0xff] %v1214_v25   ;;  %v544_v32 = vmul.f32 %v1480_v40, %v390_v28  ;;  %v560_v33 = vmul.f32 %v1480_v40, %v430_v29 }
  0xc9   :  { %v643_v48 = vadd.f32 %v1486_v42, %v575_v36  ;;  %v659_v49 = vadd.f32 %v1486_v42, %v591_v37 }
  0xca   :  { %v612_v34 = vadd.f32 %v1486_v42, %v544_v32  ;;  %v628_v35 = vadd.f32 %v1486_v42, %v560_v33 }
  0xcb   :  { %v707_v56 = vmax.f32 %v643_v48, 0.0  ;;  %v723_v57 = vmax.f32 %v659_v49, 0.0 }
  0xcc   :  { %v676_v41 = vmax.f32 %v612_v34, 0.0  ;;  %v692_v43 = vmax.f32 %v628_v35, 0.0 }
  0xce   :  { %v1099_v44 = vpack.c.bf16 %v676_v41, %v675_v38  ;;  %v1139_v45 = vpack.c.bf16 %v692_v43, %v691_v39  ;;  %v470_v46 = vpop.f32.mrf.mxu2  ;;  %v510_v47 = vpop.f32.mrf.mxu3 }
  0xcf   :  { %v576_v50 = vmul.f32 %v1480_v40, %v470_v46  ;;  %v592_v51 = vmul.f32 %v1480_v40, %v510_v47  ;;  %v393_v52 = vpop.f32.mrf.mxu0  ;;  %v433_v53 = vpop.f32.mrf.mxu1 }
  0xd0   :  { %1243 = vst [vmem:[#allocation2 + $0x18] sm:$0xff] %v1099_v44   ;;  %v545_v60 = vmul.f32 %v1480_v40, %v393_v52  ;;  %v561_v61 = vmul.f32 %v1480_v40, %v433_v53 }
  0xd1   :  { %1251 = vst [vmem:[#allocation2 + $0x58] sm:$0xff] %v1139_v45   ;;  %v644_v54 = vadd.f32 %v1486_v42, %v576_v50  ;;  %v660_v55 = vadd.f32 %v1486_v42, %v592_v51 }
  0xd2   :  { %v613_v4 = vadd.f32 %v1486_v42, %v545_v60  ;;  %v629_v5 = vadd.f32 %v1486_v42, %v561_v61 }
  0xd3   :  { %v708_v58 = vmax.f32 %v644_v54, 0.0  ;;  %v724_v59 = vmax.f32 %v660_v55, 0.0 }
  0xd4   :  { %v677_v12 = vmax.f32 %v613_v4, 0.0  ;;  %v693_v13 = vmax.f32 %v629_v5, 0.0 }
  0xd5   :  { %v1179_v62 = vpack.c.bf16 %v708_v58, %v707_v56  ;;  %v1219_v63 = vpack.c.bf16 %v724_v59, %v723_v57 }
  0xd6   :  { %v473_v0 = vpop.f32.mrf.mxu2  ;;  %v513_v1 = vpop.f32.mrf.mxu3 }
  0xd7   :  { %1259 = vst [vmem:[#allocation2 + $0x98] sm:$0xff] %v1179_v62   ;;  %v395_v2 = vpop.f32.mrf.mxu0  ;;  %v435_v3 = vpop.f32.mrf.mxu1  ;;  %v577_v10 = vmul.f32 %v1480_v40, %v473_v0  ;;  %v593_v11 = vmul.f32 %v1480_v40, %v513_v1 }
  0xd8   :  { %1267 = vst [vmem:[#allocation2 + $0xd8] sm:$0xff] %v1219_v63   ;;  %v546_v6 = vmul.f32 %v1480_v40, %v395_v2  ;;  %v562_v7 = vmul.f32 %v1480_v40, %v435_v3 }
  0xd9   :  { %v645_v20 = vadd.f32 %v1486_v42, %v577_v10  ;;  %v661_v21 = vadd.f32 %v1486_v42, %v593_v11 }
  0xda   :  { %v614_v8 = vadd.f32 %v1486_v42, %v546_v6  ;;  %v630_v9 = vadd.f32 %v1486_v42, %v562_v7 }
  0xdb   :  { %v709_v28 = vmax.f32 %v645_v20, 0.0  ;;  %v725_v29 = vmax.f32 %v661_v21, 0.0 }
  0xdc   :  { %v678_v14 = vmax.f32 %v614_v8, 0.0  ;;  %v694_v15 = vmax.f32 %v630_v9, 0.0 }
  0xde   :  { %v1104_v16 = vpack.c.bf16 %v678_v14, %v677_v12  ;;  %v1144_v17 = vpack.c.bf16 %v694_v15, %v693_v13  ;;  %v475_v18 = vpop.f32.mrf.mxu2  ;;  %v515_v19 = vpop.f32.mrf.mxu3 }
  0xdf   :  { %v578_v22 = vmul.f32 %v1480_v40, %v475_v18  ;;  %v594_v23 = vmul.f32 %v1480_v40, %v515_v19  ;;  %v398_v24 = vpop.f32.mrf.mxu0  ;;  %v438_v25 = vpop.f32.mrf.mxu1 }
  0xe0   :  { %1244 = vst [vmem:[#allocation2 + $0x20] sm:$0xff] %v1104_v16   ;;  %v547_v32 = vmul.f32 %v1480_v40, %v398_v24  ;;  %v563_v33 = vmul.f32 %v1480_v40, %v438_v25 }
  0xe1   :  { %1252 = vst [vmem:[#allocation2 + $0x60] sm:$0xff] %v1144_v17   ;;  %v646_v26 = vadd.f32 %v1486_v42, %v578_v22  ;;  %v662_v27 = vadd.f32 %v1486_v42, %v594_v23 }
  0xe2   :  { %v615_v41 = vadd.f32 %v1486_v42, %v547_v32  ;;  %v631_v43 = vadd.f32 %v1486_v42, %v563_v33 }
  0xe3   :  { %v710_v30 = vmax.f32 %v646_v26, 0.0  ;;  %v726_v31 = vmax.f32 %v662_v27, 0.0 }
  0xe4   :  { %v679_v50 = vmax.f32 %v615_v41, 0.0  ;;  %v695_v51 = vmax.f32 %v631_v43, 0.0 }
  0xe5   :  { %v1184_v34 = vpack.c.bf16 %v710_v30, %v709_v28  ;;  %v1224_v35 = vpack.c.bf16 %v726_v31, %v725_v29 }
  0xe6   :  { %v478_v36 = vpop.f32.mrf.mxu2  ;;  %v518_v37 = vpop.f32.mrf.mxu3 }
  0xe7   :  { %1260 = vst [vmem:[#allocation2 + $0xa0] sm:$0xff] %v1184_v34   ;;  %v400_v38 = vpop.f32.mrf.mxu0  ;;  %v440_v39 = vpop.f32.mrf.mxu1  ;;  %v579_v48 = vmul.f32 %v1480_v40, %v478_v36  ;;  %v595_v49 = vmul.f32 %v1480_v40, %v518_v37 }
  0xe8   :  { %1268 = vst [vmem:[#allocation2 + $0xe0] sm:$0xff] %v1224_v35   ;;  %v548_v44 = vmul.f32 %v1480_v40, %v400_v38  ;;  %v564_v45 = vmul.f32 %v1480_v40, %v440_v39 }
  0xe9   :  { %v647_v58 = vadd.f32 %v1486_v42, %v579_v48  ;;  %v663_v59 = vadd.f32 %v1486_v42, %v595_v49 }
  0xea   :  { %v616_v46 = vadd.f32 %v1486_v42, %v548_v44  ;;  %v632_v47 = vadd.f32 %v1486_v42, %v564_v45 }
  0xeb   :  { %v711_v2 = vmax.f32 %v647_v58, 0.0  ;;  %v727_v3 = vmax.f32 %v663_v59, 0.0 }
  0xec   :  { %v680_v52 = vmax.f32 %v616_v46, 0.0  ;;  %v696_v53 = vmax.f32 %v632_v47, 0.0 }
  0xee   :  { %v1109_v54 = vpack.c.bf16 %v680_v52, %v679_v50  ;;  %v1149_v55 = vpack.c.bf16 %v696_v53, %v695_v51  ;;  %v480_v56 = vpop.f32.mrf.mxu2  ;;  %v520_v57 = vpop.f32.mrf.mxu3 }
  0xef   :  { %v580_v60 = vmul.f32 %v1480_v40, %v480_v56  ;;  %v596_v61 = vmul.f32 %v1480_v40, %v520_v57  ;;  %v403_v62 = vpop.f32.mrf.mxu0  ;;  %v443_v63 = vpop.f32.mrf.mxu1 }
  0xf0   :  { %1245 = vst [vmem:[#allocation2 + $0x28] sm:$0xff] %v1109_v54   ;;  %v549_v6 = vmul.f32 %v1480_v40, %v403_v62  ;;  %v565_v7 = vmul.f32 %v1480_v40, %v443_v63 }
  0xf1   :  { %1253 = vst [vmem:[#allocation2 + $0x68] sm:$0xff] %v1149_v55   ;;  %v648_v0 = vadd.f32 %v1486_v42, %v580_v60  ;;  %v664_v1 = vadd.f32 %v1486_v42, %v596_v61 }
  0xf2   :  { %v617_v14 = vadd.f32 %v1486_v42, %v549_v6  ;;  %v633_v15 = vadd.f32 %v1486_v42, %v565_v7 }
  0xf3   :  { %v712_v4 = vmax.f32 %v648_v0, 0.0  ;;  %v728_v5 = vmax.f32 %v664_v1, 0.0 }
  0xf4   :  { %v681_v22 = vmax.f32 %v617_v14, 0.0  ;;  %v697_v23 = vmax.f32 %v633_v15, 0.0 }
  0xf5   :  { %v1189_v8 = vpack.c.bf16 %v712_v4, %v711_v2  ;;  %v1229_v9 = vpack.c.bf16 %v728_v5, %v727_v3 }
  0xf6   :  { %v483_v10 = vpop.f32.mrf.mxu2  ;;  %v523_v11 = vpop.f32.mrf.mxu3 }
  0xf7   :  { %1261 = vst [vmem:[#allocation2 + $0xa8] sm:$0xff] %v1189_v8   ;;  %v405_v12 = vpop.f32.mrf.mxu0  ;;  %v445_v13 = vpop.f32.mrf.mxu1  ;;  %v581_v20 = vmul.f32 %v1480_v40, %v483_v10  ;;  %v597_v21 = vmul.f32 %v1480_v40, %v523_v11 }
  0xf8   :  { %1269 = vst [vmem:[#allocation2 + $0xe8] sm:$0xff] %v1229_v9   ;;  %v550_v16 = vmul.f32 %v1480_v40, %v405_v12  ;;  %v566_v17 = vmul.f32 %v1480_v40, %v445_v13 }
  0xf9   :  { %v649_v30 = vadd.f32 %v1486_v42, %v581_v20  ;;  %v665_v31 = vadd.f32 %v1486_v42, %v597_v21 }
  0xfa   :  { %v618_v18 = vadd.f32 %v1486_v42, %v550_v16  ;;  %v634_v19 = vadd.f32 %v1486_v42, %v566_v17 }
  0xfb   :  { %v713_v38 = vmax.f32 %v649_v30, 0.0  ;;  %v729_v39 = vmax.f32 %v665_v31, 0.0 }
  0xfc   :  { %v682_v24 = vmax.f32 %v618_v18, 0.0  ;;  %v698_v25 = vmax.f32 %v634_v19, 0.0 }
  0xfe   :  { %v1114_v26 = vpack.c.bf16 %v682_v24, %v681_v22  ;;  %v1154_v27 = vpack.c.bf16 %v698_v25, %v697_v23  ;;  %v485_v28 = vpop.f32.mrf.mxu2  ;;  %v525_v29 = vpop.f32.mrf.mxu3 }
  0xff   :  { %v582_v32 = vmul.f32 %v1480_v40, %v485_v28  ;;  %v598_v33 = vmul.f32 %v1480_v40, %v525_v29  ;;  %v408_v34 = vpop.f32.mrf.mxu0  ;;  %v448_v35 = vpop.f32.mrf.mxu1 }
 0x100   :  { %1246 = vst [vmem:[#allocation2 + $0x30] sm:$0xff] %v1114_v26   ;;  %v551_v44 = vmul.f32 %v1480_v40, %v408_v34  ;;  %v567_v45 = vmul.f32 %v1480_v40, %v448_v35 }
 0x101   :  { %1254 = vst [vmem:[#allocation2 + $0x70] sm:$0xff] %v1154_v27   ;;  %v650_v36 = vadd.f32 %v1486_v42, %v582_v32  ;;  %v666_v37 = vadd.f32 %v1486_v42, %v598_v33 }
 0x102   :  { %v619_v52 = vadd.f32 %v1486_v42, %v551_v44  ;;  %v635_v53 = vadd.f32 %v1486_v42, %v567_v45 }
 0x103   :  { %v714_v41 = vmax.f32 %v650_v36, 0.0  ;;  %v730_v43 = vmax.f32 %v666_v37, 0.0 }
 0x104   :  { %v683_v60 = vmax.f32 %v619_v52, 0.0  ;;  %v699_v61 = vmax.f32 %v635_v53, 0.0 }
 0x105   :  { %v1194_v46 = vpack.c.bf16 %v714_v41, %v713_v38  ;;  %v1234_v47 = vpack.c.bf16 %v730_v43, %v729_v39 }
 0x106   :  { %v488_v48 = vpop.f32.mrf.mxu2  ;;  %v528_v49 = vpop.f32.mrf.mxu3 }
 0x107   :  { %1262 = vst [vmem:[#allocation2 + $0xb0] sm:$0xff] %v1194_v46   ;;  %v410_v50 = vpop.f32.mrf.mxu0  ;;  %v450_v51 = vpop.f32.mrf.mxu1  ;;  %v583_v58 = vmul.f32 %v1480_v40, %v488_v48  ;;  %v599_v59 = vmul.f32 %v1480_v40, %v528_v49 }
 0x108   :  { %1270 = vst [vmem:[#allocation2 + $0xf0] sm:$0xff] %v1234_v47   ;;  %v552_v54 = vmul.f32 %v1480_v40, %v410_v50  ;;  %v568_v55 = vmul.f32 %v1480_v40, %v450_v51 }
 0x109   :  { %v651_v4 = vadd.f32 %v1486_v42, %v583_v58  ;;  %v667_v5 = vadd.f32 %v1486_v42, %v599_v59 }
 0x10a   :  { %v620_v56 = vadd.f32 %v1486_v42, %v552_v54  ;;  %v636_v57 = vadd.f32 %v1486_v42, %v568_v55 }
 0x10b   :  { %v715_v10 = vmax.f32 %v651_v4, 0.0  ;;  %v731_v11 = vmax.f32 %v667_v5, 0.0 }
 0x10c   :  { %v684_v62 = vmax.f32 %v620_v56, 0.0  ;;  %v700_v63 = vmax.f32 %v636_v57, 0.0 }
 0x10e   :  { %v1119_v0 = vpack.c.bf16 %v684_v62, %v683_v60  ;;  %v1159_v1 = vpack.c.bf16 %v700_v63, %v699_v61  ;;  %v490_v2 = vpop.f32.mrf.mxu2  ;;  %v530_v3 = vpop.f32.mrf.mxu3 }
 0x10f   :  { %v584_v6 = vmul.f32 %v1480_v40, %v490_v2  ;;  %v600_v7 = vmul.f32 %v1480_v40, %v530_v3 }
 0x110   :  { %1247 = vst [vmem:[#allocation2 + $0x38] sm:$0xff] %v1119_v0  }
 0x111   :  { %1255 = vst [vmem:[#allocation2 + $0x78] sm:$0xff] %v1159_v1   ;;  %v652_v8 = vadd.f32 %v1486_v42, %v584_v6  ;;  %v668_v9 = vadd.f32 %v1486_v42, %v600_v7 }
 0x113   :  { %v716_v12 = vmax.f32 %v652_v8, 0.0  ;;  %v732_v13 = vmax.f32 %v668_v9, 0.0 }
 0x115   :  { %v1199_v14 = vpack.c.bf16 %v716_v12, %v715_v10  ;;  %v1239_v15 = vpack.c.bf16 %v732_v13, %v731_v11 }
 0x117   :  { %1263 = vst [vmem:[#allocation2 + $0xb8] sm:$0xff] %v1199_v14  }
 0x118   :  { %1271 = vst [vmem:[#allocation2 + $0xf8] sm:$0xff] %v1239_v15  }
 0x119   :  { %873 = dma.vmem_to_hbm [thread:$0]  %s866_s2, 4096, %s868_s9, [#allocation3], %s1313_s10, %s1313_s10, %s1314_s11  }
 0x11a   :  { %1310 = dma.done.wait [#allocation3], 4096  }
 0x11b   :  { %1311 = vsyncadd [#allocation3], 4294963200 }
 0x11c   :  { %878 = vsyncpa [#allocation3], 1 }

</bundles_post_ra>
